<compile_context>
chip_gen: v6e
topology: v6e:2x2x1
jax: 0.10.0
libtpu: 0.0.40
codegen_flags: <defaults>
</compile_context>

<pallas_src>
import functools
import itertools

import jax
import jax.numpy as jnp
from jax import lax
from jax.experimental import pallas as pl
from jax.experimental.pallas import tpu as pltpu


def _slf_kernel(vmin_ref, scale_ref, pos_ref, grid_ref, out_ref, *, R):
    """Trilinear interpolation of an RGB voxel grid (separable, lane-dense).

    vmin_ref : (3,)       SMEM   voxel_min
    scale_ref: (3,)       SMEM   (R-1) / (voxel_max - voxel_min)
    pos_ref  : (3, TB)    VMEM   query positions, transposed (B on lanes)
    grid_ref : (3R, R^2)  VMEM   radiance grid, row = c*R + z, col = x*R + y
    out_ref  : (3, TB)    VMEM   interpolated radiance, transposed
    """
    TB = out_ref.shape[1]
    r_iota = lax.broadcasted_iota(jnp.int32, (R, TB), 0)

    def axis_onehot(ia, fa):
        # (R, TB) linear-interpolation weights along one axis: 2 non-zeros/col.
        return (jnp.where(r_iota == ia, 1.0 - fa, 0.0)
                + jnp.where(r_iota == ia + 1, fa, 0.0))

    # ---- x/y coordinate math: one (3, TB) pass (z result recomputed later) --
    row = lax.broadcasted_iota(jnp.int32, (3, 1), 0)
    vmin_v = jnp.where(row == 0, vmin_ref[0],
                       jnp.where(row == 1, vmin_ref[1], vmin_ref[2]))
    scale_v = jnp.where(row == 0, scale_ref[0],
                        jnp.where(row == 1, scale_ref[1], scale_ref[2]))
    g = jnp.clip((pos_ref[...] - vmin_v) * scale_v, 0.0, R - 1.0)   # (3, TB)
    g0 = jnp.clip(jnp.floor(g), 0.0, R - 2.0)
    gi = g0.astype(jnp.int32)
    fr = g - g0

    wx = axis_onehot(gi[0:1, :], fr[0:1, :])                        # (R, TB)
    wy = axis_onehot(gi[1:2, :], fr[1:2, :])                        # (R, TB)

    # Bilinear xy weights (R^2, TB): outer product + reshape (one multiply
    # pass; sublane replication handled by broadcast, not VALU compares).
    wxy = (wx[:, None, :] * wy[None, :, :]).reshape(R * R, TB)

    # MXU: contract x and y:  (3R, R^2) @ (R^2, TB) -> (3R, TB)
    t = jnp.dot(grid_ref[...], wxy, preferred_element_type=jnp.float32)

    # ---- z weights recomputed after the matmul (keeps live ranges short) ----
    gz = jnp.clip((pos_ref[2:3, :] - vmin_ref[2]) * scale_ref[2], 0.0, R - 1.0)
    gz0 = jnp.clip(jnp.floor(gz), 0.0, R - 2.0)
    wz = axis_onehot(gz0.astype(jnp.int32), gz - gz0)               # (R, TB)

    # Fused z-collapse: single sublane reduce, single lane-dense (3, TB) store.
    out_ref[...] = jnp.sum(t.reshape(3, R, TB) * wz[None, :, :], axis=1)


def precompute_slf_params(rgb_grid, voxel_min, voxel_max):
    """Layout plumbing done once per grid update (keep out of the hot path)."""
    R = rgb_grid.shape[0]
    # grid2d[c*R + z, x*R + y] = rgb_grid[x, y, z, c]
    grid2d = jnp.transpose(rgb_grid.astype(jnp.float32),
                           (3, 2, 0, 1)).reshape(3 * R, R * R)
    vmin = voxel_min.astype(jnp.float32).reshape(3)
    extent = jnp.maximum((voxel_max - voxel_min).astype(jnp.float32), 1e-12)
    scale = ((R - 1.0) / extent).reshape(3)
    return grid2d, vmin, scale


def _pick_block(B, target_block):
    """Multiple of 128, <= target, and >= 2 grid steps whenever B > 128."""
    assert target_block % 128 == 0 and target_block >= 128
    half = (B + 1) // 2
    half_up = ((half + 127) // 128) * 128
    return max(128, min(target_block, half_up))


def slf_forward_t(pos_t, grid2d, vmin, scale, *, block_b=512):
    """Hot-path entry: positions and output in lane-dense (3, B) layout."""
    threeR, R2 = grid2d.shape
    R = threeR // 3
    assert R >= 2 and R2 == R * R
    B = pos_t.shape[1]

    bb = _pick_block(B, block_b)
    Bp = ((B + bb - 1) // bb) * bb
    if Bp != B:
        pos_t = jnp.pad(pos_t.astype(jnp.float32), ((0, 0), (0, Bp - B)))
    else:
        pos_t = pos_t.astype(jnp.float32)

    kernel = functools.partial(_slf_kernel, R=R)
    out_t = pl.pallas_call(
        kernel,
        out_shape=jax.ShapeDtypeStruct((3, Bp), jnp.float32),
        grid=(Bp // bb,),
        in_specs=[
            pl.BlockSpec(memory_space=pltpu.MemorySpace.SMEM),      # vmin (3,)
            pl.BlockSpec(memory_space=pltpu.MemorySpace.SMEM),      # scale (3,)
            pl.BlockSpec((3, bb), lambda i: (0, i)),                # positions
            # Resident radiance block (constant index_map -> fetched once).
            # TODO(synk): for R >~ 96 give this pipeline_mode=pl.Buffered(1)
            # and set vmem_limit_bytes explicitly (v7x: 64 MiB VMEM).
            pl.BlockSpec((3 * R, R * R), lambda i: (0, 0)),
        ],
        out_specs=pl.BlockSpec((3, bb), lambda i: (0, i)),
        compiler_params=pltpu.CompilerParams(
            dimension_semantics=("parallel",)),
    )(vmin, scale, pos_t, grid2d)

    return out_t[:, :B]


def slf_emitter_forward(position, rgb_grid, voxel_min, voxel_max, *, block_b=512):
    """SLFEmitter.forward(position) -> Le  (B, 3) convenience API."""
    grid2d, vmin, scale = precompute_slf_params(rgb_grid, voxel_min, voxel_max)
    out_t = slf_forward_t(position.astype(jnp.float32).T, grid2d, vmin, scale,
                          block_b=block_b)
    return out_t.T                                                  # (B, 3)


def _reference_forward(position, rgb_grid, voxel_min, voxel_max):
    """Pure-JAX trilinear reference (for validation only)."""
    R = rgb_grid.shape[0]
    grid_flat = rgb_grid.reshape(R * R * R, 3)
    g = (position - voxel_min[None]) / (voxel_max - voxel_min)[None] * (R - 1.0)
    g = jnp.clip(g, 0.0, R - 1.0)
    g0 = jnp.clip(jnp.floor(g), 0.0, R - 2.0)
    frac = g - g0
    g0i = g0.astype(jnp.int32)
    out = jnp.zeros((position.shape[0], 3), jnp.float32)
    for cx, cy, cz in itertools.product((0, 1), repeat=3):
        wx = frac[:, 0] if cx else (1.0 - frac[:, 0])
        wy = frac[:, 1] if cy else (1.0 - frac[:, 1])
        wz = frac[:, 2] if cz else (1.0 - frac[:, 2])
        wt = (wx * wy * wz)[:, None]
        idx = ((g0i[:, 0] + cx) * R * R + (g0i[:, 1] + cy) * R
               + (g0i[:, 2] + cz))
        out = out + wt * jnp.take(grid_flat, idx, axis=0)
    return out


if __name__ == "__main__":
    key = jax.random.PRNGKey(0)
    k_pos, k_grid = jax.random.split(key)

    B = 1000          # exercises padding, block_b=512 and >= 2 grid steps
    R = 8             # voxel grid resolution (R x R x R)

    voxel_min = jnp.array([-1.0, -1.0, -1.0], jnp.float32)
    voxel_max = jnp.array([1.0, 1.0, 1.0], jnp.float32)

    # Deterministic synthetic parameters (VoxelSLF per-voxel diffuse radiance).
    rgb_grid = jax.random.uniform(k_grid, (R, R, R, 3), jnp.float32)

    # Query positions inside the voxel volume.
    position = jax.random.uniform(k_pos, (B, 3), jnp.float32,
                                  minval=-0.95, maxval=0.95)

    le = slf_emitter_forward(position, rgb_grid, voxel_min, voxel_max)
    le = jax.block_until_ready(le)

    ref = _reference_forward(position, rgb_grid, voxel_min, voxel_max)
    assert le.shape == (B, 3)
    assert jnp.allclose(le, ref, atol=1e-4, rtol=1e-4), (
        float(jnp.max(jnp.abs(le - ref))))

    print("KERNEL_OK")
</pallas_src>

<mosaic_0001>
module attributes {stable_mosaic.version = 11 : i64} {
  func.func @_slf_kernel(%arg0: i32, %arg1: memref<3xf32, #tpu.memory_space<smem>>, %arg2: memref<3xf32, #tpu.memory_space<smem>>, %arg3: memref<3x512xf32, #tpu.memory_space<vmem>>, %arg4: memref<24x64xf32, #tpu.memory_space<vmem>>, %arg5: memref<3x512xf32, #tpu.memory_space<vmem>>) attributes {dimension_semantics = [#tpu.dimension_semantics<parallel>], iteration_bounds = array<i64: 2>, scalar_prefetch = 0 : i64, scratch_operands = 0 : i64, tpu.core_type = #tpu.core_type<tc>, window_params = [{transform_indices = @transform_0, window_bounds = array<i64: 3>}, {transform_indices = @transform_1, window_bounds = array<i64: 3>}, {transform_indices = @transform_2, window_bounds = array<i64: 3, 512>}, {pipeline_mode = #tpu.pipeline_mode<synchronous>, transform_indices = @transform_3, window_bounds = array<i64: 24, 64>}, {transform_indices = @transform_4, window_bounds = array<i64: 3, 512>}]} {
    %0 = tpu.iota {dimensions = array<i32: 0>} : vector<8x512xi32>
    %1 = tpu.iota {dimensions = array<i32: 0>} : vector<3x1xi32>
    %c0_i32 = arith.constant 0 : i32
    %2 = vector.broadcast %c0_i32 : i32 to vector<3x1xi32>
    %3 = arith.cmpi eq, %1, %2 : vector<3x1xi32>
    %c0 = arith.constant 0 : index
    %4 = memref.load %arg1[%c0] : memref<3xf32, #tpu.memory_space<smem>>
    %c1_i32 = arith.constant 1 : i32
    %5 = vector.broadcast %c1_i32 : i32 to vector<3x1xi32>
    %6 = arith.cmpi eq, %1, %5 : vector<3x1xi32>
    %c1 = arith.constant 1 : index
    %7 = memref.load %arg1[%c1] : memref<3xf32, #tpu.memory_space<smem>>
    %c2 = arith.constant 2 : index
    %8 = memref.load %arg1[%c2] : memref<3xf32, #tpu.memory_space<smem>>
    %9 = vector.broadcast %7 : f32 to vector<3x1xf32>
    %10 = vector.broadcast %8 : f32 to vector<3x1xf32>
    %11 = arith.select %6, %9, %10 : vector<3x1xi1>, vector<3x1xf32>
    %12 = vector.broadcast %4 : f32 to vector<3x1xf32>
    %13 = arith.select %3, %12, %11 : vector<3x1xi1>, vector<3x1xf32>
    %c0_i32_0 = arith.constant 0 : i32
    %14 = vector.broadcast %c0_i32_0 : i32 to vector<3x1xi32>
    %15 = arith.cmpi eq, %1, %14 : vector<3x1xi32>
    %c0_1 = arith.constant 0 : index
    %16 = memref.load %arg2[%c0_1] : memref<3xf32, #tpu.memory_space<smem>>
    %c1_i32_2 = arith.constant 1 : i32
    %17 = vector.broadcast %c1_i32_2 : i32 to vector<3x1xi32>
    %18 = arith.cmpi eq, %1, %17 : vector<3x1xi32>
    %c1_3 = arith.constant 1 : index
    %19 = memref.load %arg2[%c1_3] : memref<3xf32, #tpu.memory_space<smem>>
    %c2_4 = arith.constant 2 : index
    %20 = memref.load %arg2[%c2_4] : memref<3xf32, #tpu.memory_space<smem>>
    %21 = vector.broadcast %19 : f32 to vector<3x1xf32>
    %22 = vector.broadcast %20 : f32 to vector<3x1xf32>
    %23 = arith.select %18, %21, %22 : vector<3x1xi1>, vector<3x1xf32>
    %24 = vector.broadcast %16 : f32 to vector<3x1xf32>
    %25 = arith.select %15, %24, %23 : vector<3x1xi1>, vector<3x1xf32>
    %c0_5 = arith.constant 0 : index
    %c0_6 = arith.constant 0 : index
    %26 = vector.load %arg3[%c0_5, %c0_6] : memref<3x512xf32, #tpu.memory_space<vmem>>, vector<3x512xf32>
    %27 = vector.broadcast %13 : vector<3x1xf32> to vector<3x512xf32>
    %28 = arith.subf %26, %27 : vector<3x512xf32>
    %29 = vector.broadcast %25 : vector<3x1xf32> to vector<3x512xf32>
    %30 = arith.mulf %28, %29 : vector<3x512xf32>
    %cst = arith.constant 0.000000e+00 : f32
    %cst_7 = arith.constant 7.000000e+00 : f32
    %31 = vector.broadcast %cst : f32 to vector<3x512xf32>
    %32 = arith.maximumf %31, %30 : vector<3x512xf32>
    %33 = vector.broadcast %cst_7 : f32 to vector<3x512xf32>
    %34 = arith.minimumf %33, %32 : vector<3x512xf32>
    %35 = math.floor %34 : vector<3x512xf32>
    %cst_8 = arith.constant 0.000000e+00 : f32
    %cst_9 = arith.constant 6.000000e+00 : f32
    %36 = vector.broadcast %cst_8 : f32 to vector<3x512xf32>
    %37 = arith.maximumf %36, %35 : vector<3x512xf32>
    %38 = vector.broadcast %cst_9 : f32 to vector<3x512xf32>
    %39 = arith.minimumf %38, %37 : vector<3x512xf32>
    %40 = arith.fptosi %39 : vector<3x512xf32> to vector<3x512xi32>
    %41 = arith.subf %34, %39 : vector<3x512xf32>
    %42 = vector.extract_strided_slice %40 {offsets = [0, 0], sizes = [1, 512], strides = [1, 1]} : vector<3x512xi32> to vector<1x512xi32>
    %43 = vector.extract_strided_slice %41 {offsets = [0, 0], sizes = [1, 512], strides = [1, 1]} : vector<3x512xf32> to vector<1x512xf32>
    %44 = vector.broadcast %42 : vector<1x512xi32> to vector<8x512xi32>
    %45 = arith.cmpi eq, %0, %44 : vector<8x512xi32>
    %cst_10 = arith.constant 1.000000e+00 : f32
    %46 = vector.broadcast %cst_10 : f32 to vector<1x512xf32>
    %47 = arith.subf %46, %43 : vector<1x512xf32>
    %cst_11 = arith.constant 0.000000e+00 : f32
    %48 = vector.shape_cast %47 : vector<1x512xf32> to vector<1x512xf32>
    %49 = vector.broadcast %48 : vector<1x512xf32> to vector<8x512xf32>
    %50 = vector.broadcast %cst_11 : f32 to vector<8x512xf32>
    %51 = arith.select %45, %49, %50 : vector<8x512xi1>, vector<8x512xf32>
    %c1_i32_12 = arith.constant 1 : i32
    %52 = vector.broadcast %c1_i32_12 : i32 to vector<1x512xi32>
    %53 = arith.addi %42, %52 : vector<1x512xi32>
    %54 = vector.broadcast %53 : vector<1x512xi32> to vector<8x512xi32>
    %55 = arith.cmpi eq, %0, %54 : vector<8x512xi32>
    %cst_13 = arith.constant 0.000000e+00 : f32
    %56 = vector.shape_cast %43 : vector<1x512xf32> to vector<1x512xf32>
    %57 = vector.broadcast %56 : vector<1x512xf32> to vector<8x512xf32>
    %58 = vector.broadcast %cst_13 : f32 to vector<8x512xf32>
    %59 = arith.select %55, %57, %58 : vector<8x512xi1>, vector<8x512xf32>
    %60 = arith.addf %51, %59 : vector<8x512xf32>
    %61 = vector.extract_strided_slice %40 {offsets = [1, 0], sizes = [1, 512], strides = [1, 1]} : vector<3x512xi32> to vector<1x512xi32>
    %62 = vector.extract_strided_slice %41 {offsets = [1, 0], sizes = [1, 512], strides = [1, 1]} : vector<3x512xf32> to vector<1x512xf32>
    %63 = vector.broadcast %61 : vector<1x512xi32> to vector<8x512xi32>
    %64 = arith.cmpi eq, %0, %63 : vector<8x512xi32>
    %cst_14 = arith.constant 1.000000e+00 : f32
    %65 = vector.broadcast %cst_14 : f32 to vector<1x512xf32>
    %66 = arith.subf %65, %62 : vector<1x512xf32>
    %cst_15 = arith.constant 0.000000e+00 : f32
    %67 = vector.shape_cast %66 : vector<1x512xf32> to vector<1x512xf32>
    %68 = vector.broadcast %67 : vector<1x512xf32> to vector<8x512xf32>
    %69 = vector.broadcast %cst_15 : f32 to vector<8x512xf32>
    %70 = arith.select %64, %68, %69 : vector<8x512xi1>, vector<8x512xf32>
    %c1_i32_16 = arith.constant 1 : i32
    %71 = vector.broadcast %c1_i32_16 : i32 to vector<1x512xi32>
    %72 = arith.addi %61, %71 : vector<1x512xi32>
    %73 = vector.broadcast %72 : vector<1x512xi32> to vector<8x512xi32>
    %74 = arith.cmpi eq, %0, %73 : vector<8x512xi32>
    %cst_17 = arith.constant 0.000000e+00 : f32
    %75 = vector.shape_cast %62 : vector<1x512xf32> to vector<1x512xf32>
    %76 = vector.broadcast %75 : vector<1x512xf32> to vector<8x512xf32>
    %77 = vector.broadcast %cst_17 : f32 to vector<8x512xf32>
    %78 = arith.select %74, %76, %77 : vector<8x512xi1>, vector<8x512xf32>
    %79 = arith.addf %70, %78 : vector<8x512xf32>
    %80 = vector.shape_cast %60 : vector<8x512xf32> to vector<8x1x512xf32>
    %81 = vector.shape_cast %79 : vector<8x512xf32> to vector<1x8x512xf32>
    %82 = vector.broadcast %80 : vector<8x1x512xf32> to vector<8x8x512xf32>
    %83 = vector.broadcast %81 : vector<1x8x512xf32> to vector<8x8x512xf32>
    %84 = arith.mulf %82, %83 : vector<8x8x512xf32>
    %85 = vector.shape_cast %84 : vector<8x8x512xf32> to vector<64x512xf32>
    %c0_18 = arith.constant 0 : index
    %c0_19 = arith.constant 0 : index
    %86 = vector.load %arg4[%c0_18, %c0_19] : memref<24x64xf32, #tpu.memory_space<vmem>>, vector<24x64xf32>
    %cst_20 = arith.constant dense<0.000000e+00> : vector<24x512xf32>
    %87 = tpu.matmul %86, %85, %cst_20 {dimension_numbers = #tpu.dot_dimension_numbers<[1], [0], [0], [1], [0, 0, 1, 1], [], []>} : vector<24x64xf32>, vector<64x512xf32>, vector<24x512xf32> -> vector<24x512xf32>
    %c2_21 = arith.constant 2 : index
    %c0_22 = arith.constant 0 : index
    %88 = vector.load %arg3[%c2_21, %c0_22] : memref<3x512xf32, #tpu.memory_space<vmem>>, vector<1x512xf32>
    %c2_23 = arith.constant 2 : index
    %89 = memref.load %arg1[%c2_23] : memref<3xf32, #tpu.memory_space<smem>>
    %90 = vector.broadcast %89 : f32 to vector<1x512xf32>
    %91 = arith.subf %88, %90 : vector<1x512xf32>
    %c2_24 = arith.constant 2 : index
    %92 = memref.load %arg2[%c2_24] : memref<3xf32, #tpu.memory_space<smem>>
    %93 = vector.broadcast %92 : f32 to vector<1x512xf32>
    %94 = arith.mulf %91, %93 : vector<1x512xf32>
    %cst_25 = arith.constant 0.000000e+00 : f32
    %cst_26 = arith.constant 7.000000e+00 : f32
    %95 = vector.broadcast %cst_25 : f32 to vector<1x512xf32>
    %96 = arith.maximumf %95, %94 : vector<1x512xf32>
    %97 = vector.broadcast %cst_26 : f32 to vector<1x512xf32>
    %98 = arith.minimumf %97, %96 : vector<1x512xf32>
    %99 = math.floor %98 : vector<1x512xf32>
    %cst_27 = arith.constant 0.000000e+00 : f32
    %cst_28 = arith.constant 6.000000e+00 : f32
    %100 = vector.broadcast %cst_27 : f32 to vector<1x512xf32>
    %101 = arith.maximumf %100, %99 : vector<1x512xf32>
    %102 = vector.broadcast %cst_28 : f32 to vector<1x512xf32>
    %103 = arith.minimumf %102, %101 : vector<1x512xf32>
    %104 = arith.fptosi %103 : vector<1x512xf32> to vector<1x512xi32>
    %105 = arith.subf %98, %103 : vector<1x512xf32>
    %106 = vector.broadcast %104 : vector<1x512xi32> to vector<8x512xi32>
    %107 = arith.cmpi eq, %0, %106 : vector<8x512xi32>
    %cst_29 = arith.constant 1.000000e+00 : f32
    %108 = vector.broadcast %cst_29 : f32 to vector<1x512xf32>
    %109 = arith.subf %108, %105 : vector<1x512xf32>
    %cst_30 = arith.constant 0.000000e+00 : f32
    %110 = vector.shape_cast %109 : vector<1x512xf32> to vector<1x512xf32>
    %111 = vector.broadcast %110 : vector<1x512xf32> to vector<8x512xf32>
    %112 = vector.broadcast %cst_30 : f32 to vector<8x512xf32>
    %113 = arith.select %107, %111, %112 : vector<8x512xi1>, vector<8x512xf32>
    %c1_i32_31 = arith.constant 1 : i32
    %114 = vector.broadcast %c1_i32_31 : i32 to vector<1x512xi32>
    %115 = arith.addi %104, %114 : vector<1x512xi32>
    %116 = vector.broadcast %115 : vector<1x512xi32> to vector<8x512xi32>
    %117 = arith.cmpi eq, %0, %116 : vector<8x512xi32>
    %cst_32 = arith.constant 0.000000e+00 : f32
    %118 = vector.shape_cast %105 : vector<1x512xf32> to vector<1x512xf32>
    %119 = vector.broadcast %118 : vector<1x512xf32> to vector<8x512xf32>
    %120 = vector.broadcast %cst_32 : f32 to vector<8x512xf32>
    %121 = arith.select %117, %119, %120 : vector<8x512xi1>, vector<8x512xf32>
    %122 = arith.addf %113, %121 : vector<8x512xf32>
    %123 = vector.shape_cast %87 : vector<24x512xf32> to vector<3x8x512xf32>
    %124 = vector.shape_cast %122 : vector<8x512xf32> to vector<1x8x512xf32>
    %125 = vector.broadcast %124 : vector<1x8x512xf32> to vector<3x8x512xf32>
    %126 = arith.mulf %123, %125 : vector<3x8x512xf32>
    %cst_33 = arith.constant dense<0.000000e+00> : vector<3x512xf32>
    %127 = vector.multi_reduction <add>, %126, %cst_33 [1] : vector<3x8x512xf32> to vector<3x512xf32>
    %c0_34 = arith.constant 0 : index
    %c0_35 = arith.constant 0 : index
    %128 = vector.load %arg5[%c0_34, %c0_35] : memref<3x512xf32, #tpu.memory_space<vmem>>, vector<3x512xf32>
    tpu.vector_store %arg5[%c0_34, %c0_35], %127 {strides = array<i32>} : memref<3x512xf32, #tpu.memory_space<vmem>>, vector<3x512xf32>,
    return
  }
  func.func @transform_0(%arg0: i32) -> i32 {
    %c0_i32 = arith.constant 0 : i32
    %c0_i32_0 = arith.constant 0 : i32
    return %c0_i32 : i32
  }
  func.func @transform_1(%arg0: i32) -> i32 {
    %c0_i32 = arith.constant 0 : i32
    %c0_i32_0 = arith.constant 0 : i32
    return %c0_i32 : i32
  }
  func.func @transform_2(%arg0: i32) -> (i32, i32) {
    %c0_i32 = arith.constant 0 : i32
    %c0_i32_0 = arith.constant 0 : i32
    return %c0_i32, %arg0 : i32, i32
  }
  func.func @transform_3(%arg0: i32) -> (i32, i32) {
    %c0_i32 = arith.constant 0 : i32
    %c0_i32_0 = arith.constant 0 : i32
    %c0_i32_1 = arith.constant 0 : i32
    return %c0_i32, %c0_i32_0 : i32, i32
  }
  func.func @transform_4(%arg0: i32) -> (i32, i32) {
    %c0_i32 = arith.constant 0 : i32
    %c0_i32_0 = arith.constant 0 : i32
    return %c0_i32, %arg0 : i32, i32
  }
}

</mosaic_0001>

<bundles_post_ra>
// kernel: tpu_custom_call.1
= control target key start
LH: loop header
LB: loop body
LE: loop exit
PB: predicated region body
PF: predicated region fallthrough
CT: control target
= control target key end

     0   :  { %9 = vsyncpa [#allocation5], 0  ;;  %s2235_s0 = inlined_call_operand.hbm [shape: f32[3], index: 0, kind: input, shape index: {}]   ;;  %s2236_s1 = inlined_call_operand.vmem [shape: f32[3], index: 1, kind: input, shape index: {}]   ;;  %s2237_s2 = inlined_call_operand.hbm [shape: f32[3,1024], index: 2, kind: input, shape index: {}]   ;;  %s2238_s3 = inlined_call_operand.hbm [shape: f32[24,64], index: 3, kind: input, shape index: {}]   ;;  %s2239_s4 = inlined_call_operand.hbm [shape: f32[3,1024], index: 4, kind: output, shape index: {}]  }
   0x1   :  { %10 = vsyncpa [#allocation6], 0 }
   0x2   :  { %11 = vsyncpa [#allocation3], 0 }
   0x3   :  { %13 = vsyncpa [#allocation3 + $0x1], 0 }
   0x4   :  { %14 = vsyncpa [#allocation10], 0 }
   0x5   :  { %15 = vsyncpa [#allocation4], 0 }
   0x6   :  { %17 = vsyncpa [#allocation4 + $0x1], 0  ;;  %s1739_s15 = smov 0   ;;  %s1741_s16 = smov 0  }
   0x7   :  { %s1743_s17 = smov 0   ;;  %s1745_s18 = smov 0  }
   0x8 LB: > { %s1760_s19 = sadd.s32 4294967295, %s1702_s18   ;;  %s1425_s20 = sadd.s32 4294967294, %s1702_s18   ;;  %s1702_s18 = sphi %s1745_s18, %s2265_s18   ;;  %s1698_s17 = sphi %s1743_s17, %s2264_s17   ;;  %s1694_s16 = sphi %s1741_s16, %s2263_s16   ;;  %s1690_s15 = sphi %s1739_s15, %s2262_s15  }
   0x9   : > { %p85_p0 = scmp.ne.s32.totalorder %s1694_s16, %s1690_s15  ;;  %p2240_p1 = scmp.eq.s32.totalorder %s1760_s19, 0 }
   0xa   : > { %p136_p3 = scmp.eq.s32.totalorder %s1425_s20, 1  ;;  %p1426_p5 = scmp.ge.s32.totalorder %s1702_s18, 1 }
   0xb   : > { %p1769_p4 = por %p2240_p1, %p85_p0  ;;  %p143_p7 = scmp.lt.s32.totalorder %s1702_s18, 3 }
   0xc   : > { %p1774_p6 = por %p136_p3, %p85_p0  ;;  %s165_s26 = sshll.u32 %s2236_s1, 4  ;;  %s166_s26 = int_to_ptr.vmem [resolvable:$true] %s165_s26 }
   0xd   : > { %s2244_s21 = scalar_select %p1769_p4, 1, 0 }
   0xe   : > { %s2245_s22 = scalar_select %p1774_p6, 1, 0 }
   0xf   : > { %p1779_p8 = pnand %p1426_p5, %p143_p7  ;;  %s1704_s28 = smov [#allocation9]  }
  0x10   : > { %s175_s29 = sshll.u32 %s1704_s28, 4  ;;  %s1705_s30 = smov [#allocation2]   ;;  %s1795_s29 = int_to_ptr.vmem [resolvable:$true] %s175_s29 }
  0x11   : > { %s2246_s23 = scalar_select %p1779_p8, 1, 0 }
  0x12   : > { %p1480_p10 = pneg %p1779_p8  ;;  %s1557_s7 = scalar_lea.vmem %s166_s26, 16 }
  0x13   : > { %p1558_p12 = scmp.ne.s32.totalorder %s166_s26, %s1557_s7  ;;  %p1565_p5 = scmp.lt.s32.totalorder %s166_s26, %s166_s26 }
  0x14   : > { %p1791_p11 = pnand %p1480_p10, %p2240_p1  ;;  %p1566_p7 = scmp.lt.s32.totalorder %s1557_s7, %s1557_s7 }
  0x16   : > { %1483 = dma.hbm_to_smem (!%p1791_p11), %s2235_s0, 16, %s1705_s30, [#allocation5]  }
  0x17   : > { %p1559_p13 = pneg %p1791_p11  ;;  %p1567_p10 = por %p1566_p7, %p1565_p5 }
  0x19   : > { %p1560_p0 = pnand %p1559_p13, %p1558_p12 }
  0x1b   : > { %p1561_p3 = pneg %p1560_p0 }
  0x1d   : > { %p1568_p9 = pnand %p1567_p10, %p1561_p3 }
  0x1f   : > { %1571 = shalt.err (!%p1568_p9)
}
  0x20   : > { %s1706_s8 = smov [#allocation7]   ;;  %s1583_s9 = scalar_lea.vmem %s1795_s29, 384 }
  0x21   : > { %1486 = dma.vmem_to_smem (!%p1791_p11), %s166_s26, 16, %s1706_s8, [#allocation6]  }
  0x22   : > { %p1584_p1 = scmp.ne.s32.totalorder %s1795_s29, %s1583_s9  ;;  %p1591_p4 = scmp.lt.s32.totalorder %s1795_s29, %s1795_s29 }
  0x23   : > { %p1592_p12 = scmp.lt.s32.totalorder %s1583_s9, %s1583_s9 }
  0x24   : > { %p1586_p2 = pnand %p1584_p1, %p1559_p13 }
  0x25   : > { %p1593_p0 = por %p1592_p12, %p1591_p4 }
  0x26   : > { %p1587_p6 = pneg %p1586_p2 }
  0x28   : > { %p1594_p8 = pnand %p1593_p0, %p1587_p6 }
  0x2a   : > { %1597 = shalt.err (!%p1594_p8)
}
  0x2b   : > { %s1707_s10 = smov 128   ;;  %s1708_s11 = smov 8  }
  0x2c   : > { %1489 = dma.hbm_to_vmem [thread:$0]  (!%p1791_p11), %s2238_s3, 384, %s1795_s29, [#allocation10], %s1707_s10, %s1707_s10, %s1708_s11  }
  0x2d   : > { %s1817_s14 = sadd.s32 1, %s1702_s18   ;;  %s72_s24 = sadd.s32 1, %s1698_s17 }
  0x2e   : > { %s69_s20 = ssub.s32 %s1702_s18, %s1817_s14  ;;  %p79_p2 = scmp.ne.s32.totalorder %s1698_s17, %s1694_s16 }
  0x2f   : > { %p70_p1 = scmp.eq.s32.totalorder %s69_s20, 0  ;;  %p80_p4 = scmp.eq.s32.totalorder %s1702_s18, 0 }
  0x30   : > { %p1501_p6 = scmp.lt.s32.totalorder %s1702_s18, 2  ;;  %p2248_p9 = scmp.eq.s32.totalorder %s1760_s19, 1 }
  0x31   : > { %s1827_s25 = scalar_select %p70_p1, %s1698_s17, %s72_s24  }
  0x32   : > { %p81_p8 = por %p80_p4, %p79_p2  ;;  %p1831_p13 = por %p2248_p9, %p79_p2 }
  0x33   : > { %s189_s27 = sand.u32 1, %s1698_s17   ;;  %s1456_s28 = sshll.u32 %s1702_s18, 8 }
  0x34   : > { %s2249_s26 = scalar_select %p1831_p13, 1, 0 }
  0x35   : > { %s1431_s29 = sshll.u32 %s189_s27, 4  ;;  %s1840_s6 = scalar_lea.hbm %s2237_s2, %s1456_s28 }
  0x36   : > { %s193_s7 = scalar_lea.vmem [#allocation8], %s1431_s29  ;;  %p1842_p11 = pnand %p1501_p6, %p81_p8 }
  0x37   : > { %s201_s8 = sshll.u32 %s193_s7, 4  ;;  %s190_s10 = scalar_lea.sflag [#allocation3], %s189_s27  ;;  %s202_s8 = int_to_ptr.vmem [resolvable:$true] %s201_s8 }
  0x38   : > { %s1598_s11 = scalar_lea.hbm %s1840_s6, 256  ;;  %p1600_p5 = pneg %p1842_p11 }
  0x39   : > { %p1599_p3 = scmp.ne.s32.totalorder %s1840_s6, %s1598_s11  ;;  %s1603_s20 = scalar_lea.hbm %s2237_s2, 512 }
  0x3a   : > { %p1604_p12 = scmp.lt.s32.totalorder %s1840_s6, %s2237_s2  ;;  %p1605_p0 = scmp.lt.s32.totalorder %s1603_s20, %s1598_s11 }
  0x3b   : > { %p1601_p7 = pnand %p1600_p5, %p1599_p3 }
  0x3c   : > { %p1606_p1 = por %p1605_p0, %p1604_p12 }
  0x3d   : > { %p1602_p10 = pneg %p1601_p7 }
  0x3f   : > { %p1607_p2 = pnand %p1606_p1, %p1602_p10 }
  0x41   : > { %1610 = shalt.err (!%p1607_p2)
}
  0x42   : > { %s1611_s29 = scalar_lea.vmem %s202_s8, 256  ;;  %s1709_s27 = smov [#allocation8]  }
  0x43   : > { %p1612_p4 = scmp.ne.s32.totalorder %s202_s8, %s1611_s29  ;;  %s1616_s30 = sshll.u32 %s1709_s27, 4  ;;  %s1617_s30 = int_to_ptr.vmem [resolvable:$false] %s1616_s30 }
  0x44   : > { %s1618_s5 = scalar_lea.vmem %s1617_s30, 512  ;;  %p1619_p9 = scmp.lt.s32.totalorder %s202_s8, %s1617_s30 }
  0x45   : > { %p1614_p6 = pnand %p1612_p4, %p1600_p5  ;;  %p1620_p3 = scmp.lt.s32.totalorder %s1618_s5, %s1611_s29 }
  0x47   : > { %p1615_p8 = pneg %p1614_p6  ;;  %p1621_p7 = por %p1620_p3, %p1619_p9 }
  0x49   : > { %p1622_p13 = pnand %p1621_p7, %p1615_p8 }
  0x4b   : > { %1625 = shalt.err (!%p1622_p13)
}
  0x4c   : > { %1493 = dma.hbm_to_vmem [thread:$0]  (!%p1842_p11), %s1840_s6, 256, %s202_s8, %s190_s10  }
  0x4d   : > { %p2251_p10 = scmp.ne.s32.totalorder %s2246_s23, 0 }
  0x4e   : > { %p2252_p12 = scmp.eq.s32.totalorder (!%p2251_p10), %s1760_s19, 0 }
  0x4f   : > { %210 = sbr.rel (%p2251_p10) target bundleno = 428 (0x1ac), region = 36 }
  0x54   : > { %1669 = dma.done.wait (%p2252_p12), [#allocation5], 16   ;;  %p2253_p5 = pmov %p2252_p12 }
  0x56   : > { %1671 = vsyncadd (%p2253_p5), [#allocation5], 4294967280  ;;  %p2254_p0 = pmov %p2253_p5 }
  0x58   : > { %1673 = dma.done.wait (%p2254_p0), [#allocation6], 16   ;;  %p2255_p1 = pmov %p2254_p0 }
  0x59   : > { %s1871_s7 = sand.u32 1, %s1694_s16   ;;  %p2256_p13 = scmp.ne.s32.totalorder %s2244_s21, 0 }
  0x5a   : > { %1675 = vsyncadd (%p2255_p1), [#allocation6], 4294967280  ;;  %s1437_s23 = sshll.u32 %s1871_s7, 4  ;;  %s221_s6 = scalar_lea.sflag [#allocation3], %s1871_s7 }
  0x5b   : > { %s1877_s8 = scalar_lea.vmem [#allocation8], %s1437_s23 }
  0x5c   : > { %1677 = dma.done.wait (%p2256_p13), %s221_s6, 256  }
  0x5d   : > { %1679 = vsyncadd (%p2256_p13), %s221_s6, 4294967040  ;;  %p2257_p11 = pmov %p2254_p0 }
  0x5e   : > { %p2258_p2 = pmov %p2254_p0 }
  0x5f   : > { %1681 = dma.done.wait (%p2257_p11), [#allocation10], 384  }
  0x60   : > { %1683 = vsyncadd (%p2258_p2), [#allocation10], 4294966912 }
  0x61   : > { %233 = sfence }
  0x62   : > { %v256_v0 = vlaneseq  ;;  %s259_s9 = sld [smem:[#allocation2]]  ;;  %v1710_v2 = vmov 839922192   ;;  %v1711_v4 = vmov 0.0   ;;  %v276_v14 = vld [vmem:[%s1877_s8] sm:$0x77] }
  0x63   : > { %s1440_s10 = sld [smem:[#allocation2 + $0x1]]  ;;  %v280_v3 = vunpack.c.l.s4 %v1710_v2  ;;  %975 = vmatprep.mubr.f32.mxu0 %v1711_v4  ;;  %1058 = vmatprep.mubr.f32.mxu1 %v1711_v4  ;;  %v277_v15 = vld [vmem:[%s1877_s8 + $0x8] sm:$0x77]  ;;  %v1712_v29 = vmov 1966171168   ;;  %s1457_s20 = sshll.u32 %s1760_s19, 8 }
  0x64   : > { %v1887_v1 = vshrl.u32 %v256_v0, 7  ;;  %s1889_s11 = sld [smem:[#allocation2 + $0x2]]  ;;  %v643_v30 = vunpack.c.l.s4 %v1712_v29  ;;  %s253_s24 = scalar_lea.vmem [#allocation11], %s1437_s23 }
  0x65   : > { %s268_s21 = sld [smem:[#allocation7]]  ;;  %v281_v5 = vunpack.c.0.s8 %v280_v3  ;;  %s1321_s28 = sshll.u32 %s253_s24, 4  ;;  %s2194_s28 = int_to_ptr.vmem [resolvable:$true] %s1321_s28 }
  0x66   : > { %s1442_s12 = sld [smem:[#allocation7 + $0x1]]  ;;  %vm260_vm0 = vcmp.eq.s32.totalorder %v1887_v1, 1  ;;  %vm258_vm1 = vcmp.eq.s32.totalorder %v1887_v1, 0  ;;  %v644_v35 = vunpack.c.0.s8 %v643_v30  ;;  %v1907_v38 = vsub.s32 0, %v1887_v1  ;;  %s2192_s30 = scalar_lea.hbm %s2239_s4, %s1457_s20 }
  0x67   : > { %s1893_s13 = sld [smem:[#allocation7 + $0x2]]  ;;  %v284_v8 = vsub.s32 %v281_v5, %v1887_v1  ;;  %v320_v39 = vsub.s32 4, %v1887_v1  ;;  %v1911_v40 = vsub.s32 1, %v1887_v1  ;;  %v1918_v45 = vsub.s32 5, %v1887_v1  ;;  %s1307_s19 = scalar_lea.sflag [#allocation4], %s1871_s7 }
  0x68   : > { %v266_v7 = vstv %s259_s9  ;;  %v1921_v46 = vsub.s32 %v644_v35, %v1887_v1  ;;  %v1924_v47 = vsub.s32 3, %v1887_v1  ;;  %v1927_v48 = vsub.s32 2, %v1887_v1  ;;  %s1626_s5 = scalar_lea.vmem %s2194_s28, 256  ;;  %p2259_p6 = scmp.ne.s32.totalorder %s2249_s26, 0 }
  0x69   : > { %v263_v6 = vstv %s1440_s10  ;;  %p1627_p4 = scmp.ne.s32.totalorder %s2194_s28, %s1626_s5  ;;  %s1713_s23 = smov [#allocation11]  }
  0x6a   : > { %v264_v9 = vstv %s1889_s11  ;;  %s1630_s6 = sshll.u32 %s1713_s23, 4  ;;  %s1631_s6 = int_to_ptr.vmem [resolvable:$false] %s1630_s6 }
  0x6b   : > { %v265_v10 = vsel %vm260_vm0, %v263_v6, %v264_v9  ;;  %v274_v13 = vstv %s268_s21  ;;  %p1628_p8 = pnand %p1627_p4, %p2259_p6  ;;  %p1633_p3 = scmp.lt.s32.totalorder %s2194_s28, %s1631_s6 }
  0x6c   : > { %v267_v11 = vsel %vm258_vm1, %v266_v7, %v265_v10  ;;  %v271_v12 = vstv %s1442_s12 }
  0x6d   : > { %v272_v16 = vstv %s1893_s13  ;;  %v285_v17 = vrot.slane %v267_v11, %v284_v8  ;;  %p1629_p9 = pneg %p1628_p8 }
  0x6e   : > { %v273_v18 = vsel %vm260_vm0, %v271_v12, %v272_v16 }
  0x6f   : > { %v275_v19 = vsel %vm258_vm1, %v274_v13, %v273_v18  ;;  %v287_v20 = vsub.f32 %v276_v14, %v285_v17  ;;  %v288_v21 = vsub.f32 %v277_v15, %v285_v17 }
  0x70   : > { %v296_v22 = vrot.slane %v275_v19, %v284_v8 }
  0x72   : > { %v298_v23 = vmul.f32 %v296_v22, %v287_v20  ;;  %v299_v24 = vmul.f32 %v296_v22, %v288_v21 }
  0x74   : > { %v300_v25 = vmax.f32 %v298_v23, 0.0  ;;  %v301_v26 = vmax.f32 %v299_v24, 0.0 }
  0x76   : > { %v302_v27 = vmin.f32 %v300_v25, 7.0  ;;  %v303_v28 = vmin.f32 %v301_v26, 7.0 }
  0x78   : > { %v304_v31 = vfloor.f32 %v302_v27  ;;  %v305_v32 = vfloor.f32 %v303_v28 }
  0x7a   : > { %v306_v33 = vmax.f32 %v304_v31, 0.0  ;;  %v307_v34 = vmax.f32 %v305_v32, 0.0 }
  0x7c   : > { %v308_v36 = vmin.f32 %v306_v33, 6.0  ;;  %v309_v37 = vmin.f32 %v307_v34, 6.0 }
  0x7e   : > { %v1458_v41 = vtrunc.f32 %v308_v36  ;;  %v1460_v42 = vtrunc.f32 %v309_v37  ;;  %v1913_v43 = vsub.f32 %v302_v27, %v308_v36  ;;  %v1915_v44 = vsub.f32 %v303_v28, %v309_v37 }
  0x80   : > { %v1929_v49 = vcvt.f32.s32 %v1458_v41  ;;  %v1931_v50 = vcvt.f32.s32 %v1460_v42  ;;  %v1934_v51 = vsub.f32 1.0, %v1913_v43  ;;  %v1937_v52 = vsub.f32 1.0, %v1915_v44 }
  0x81   : > { %v437_v53 = vrot.slane %v1913_v43, %v1907_v38  ;;  %v441_v54 = vrot.slane %v1913_v43, %v320_v39  ;;  %v445_v55 = vrot.slane %v1915_v44, %v1907_v38  ;;  %v449_v56 = vrot.slane %v1915_v44, %v320_v39 }
  0x82   : > { %v317_v57 = vrot.slane %v1929_v49, %v1907_v38  ;;  %v321_v58 = vrot.slane %v1929_v49, %v320_v39  ;;  %v325_v59 = vrot.slane %v1931_v50, %v1907_v38  ;;  %v329_v60 = vrot.slane %v1931_v50, %v320_v39 }
  0x83   : > { %v357_v61 = vrot.slane %v1934_v51, %v1907_v38  ;;  %v361_v62 = vrot.slane %v1934_v51, %v320_v39  ;;  %v365_v63 = vrot.slane %v1937_v52, %v1907_v38  ;;  %v369_v0 = vrot.slane %v1937_v52, %v320_v39 }
  0x84   : > { %v333_v2 = vrot.slane %v317_v57, %v1907_v38  ;;  %v337_v3 = vrot.slane %v321_v58, %v1907_v38  ;;  %v341_v5 = vrot.slane %v325_v59, %v1907_v38  ;;  %v345_v6 = vrot.slane %v329_v60, %v1907_v38 }
  0x85   : > { %v377_v7 = vrot.slane %v357_v61, %v1907_v38  ;;  %v381_v8 = vrot.slane %v361_v62, %v1907_v38  ;;  %v385_v10 = vrot.slane %v365_v63, %v1907_v38  ;;  %v389_v11 = vrot.slane %v369_v0, %v1907_v38 }
  0x86   : > { %vm346_vm2 = vcmp.eq.s32.totalorder %v1887_v1, %v333_v2  ;;  %vm347_vm3 = vcmp.eq.s32.totalorder %v1887_v1, %v337_v3  ;;  %vm348_vm4 = vcmp.eq.s32.totalorder %v1887_v1, %v341_v5  ;;  %vm349_vm5 = vcmp.eq.s32.totalorder %v1887_v1, %v345_v6 }
  0x87   : > { %v390_v12 = vsel %vm346_vm2, %v377_v7, 0.0  ;;  %v391_v13 = vsel %vm347_vm3, %v381_v8, 0.0  ;;  %v392_v14 = vsel %vm348_vm4, %v385_v10, 0.0  ;;  %v393_v15 = vsel %vm349_vm5, %v389_v11, 0.0 }
  0x88   : > { %v1970_v17 = vadd.s32 1, %v1929_v49  ;;  %v1973_v18 = vadd.s32 1, %v1931_v50  ;;  %v457_v19 = vrot.slane %v437_v53, %v1907_v38  ;;  %v461_v20 = vrot.slane %v441_v54, %v1907_v38 }
  0x89   : > { %v465_v21 = vrot.slane %v445_v55, %v1907_v38  ;;  %v469_v22 = vrot.slane %v449_v56, %v1907_v38  ;;  %v485_v23 = vrot.slane %v1929_v49, %v1918_v45  ;;  %v521_v24 = vrot.slane %v1934_v51, %v1918_v45 }
  0x8a   : > { %v399_v25 = vrot.slane %v1970_v17, %v1907_v38  ;;  %v403_v26 = vrot.slane %v1970_v17, %v320_v39  ;;  %v407_v27 = vrot.slane %v1973_v18, %v1907_v38  ;;  %v411_v28 = vrot.slane %v1973_v18, %v320_v39 }
  0x8b   : > { %v501_v29 = vrot.slane %v485_v23, %v1911_v40  ;;  %v541_v30 = vrot.slane %v521_v24, %v1911_v40  ;;  %v561_v31 = vrot.slane %v1970_v17, %v1918_v45  ;;  %v597_v32 = vrot.slane %v1913_v43, %v1918_v45 }
  0x8c   : > { %v415_v33 = vrot.slane %v399_v25, %v1907_v38  ;;  %v419_v34 = vrot.slane %v403_v26, %v1907_v38  ;;  %v423_v35 = vrot.slane %v407_v27, %v1907_v38  ;;  %v427_v36 = vrot.slane %v411_v28, %v1907_v38 }
  0x8d   : > { %vm511_vm6 = vcmp.eq.s32.totalorder %v1887_v1, %v501_v29  ;;  %v577_v37 = vrot.slane %v561_v31, %v1911_v40  ;;  %v617_v39 = vrot.slane %v597_v32, %v1911_v40  ;;  %v493_v41 = vrot.slane %v1931_v50, %v1918_v45 }
  0x8e   : > { %vm428_vm7 = vcmp.eq.s32.totalorder %v1887_v1, %v415_v33  ;;  %vm429_vm8 = vcmp.eq.s32.totalorder %v1887_v1, %v419_v34  ;;  %vm430_vm9 = vcmp.eq.s32.totalorder %v1887_v1, %v423_v35  ;;  %vm431_vm10 = vcmp.eq.s32.totalorder %v1887_v1, %v427_v36 }
  0x8f   : > { %v470_v42 = vsel %vm428_vm7, %v457_v19, 0.0  ;;  %v471_v53 = vsel %vm429_vm8, %v461_v20, 0.0  ;;  %v472_v54 = vsel %vm430_vm9, %v465_v21, 0.0  ;;  %v473_v55 = vsel %vm431_vm10, %v469_v22, 0.0 }
  0x90   : > { %v2008_v56 = vadd.f32 %v470_v42, %v390_v12  ;;  %v2010_v57 = vadd.f32 %v471_v53, %v391_v13  ;;  %v2012_v58 = vadd.f32 %v472_v54, %v392_v14  ;;  %v2014_v59 = vadd.f32 %v473_v55, %v393_v15 }
  0x91   : > { %v551_v60 = vsel %vm511_vm6, %v541_v30, 0.0  ;;  %vm587_vm11 = vcmp.eq.s32.totalorder %v1887_v1, %v577_v37  ;;  %v509_v61 = vrot.slane %v493_v41, %v1911_v40  ;;  %v529_v62 = vrot.slane %v1937_v52, %v1918_v45 }
  0x92   : > { %v627_v63 = vsel %vm587_vm11, %v617_v39, 0.0  ;;  %v639_v0 = vcombine.high %v2008_v56, %v2010_v57  ;;  %v641_v2 = vcombine.high %v2012_v58, %v2014_v59  ;;  %v569_v3 = vrot.slane %v1973_v18, %v1918_v45 }
  0x93   : > { %v2028_v5 = vadd.f32 %v627_v63, %v551_v60  ;;  %vm513_vm12 = vcmp.eq.s32.totalorder %v1887_v1, %v509_v61  ;;  %v549_v6 = vrot.slane %v529_v62, %v1911_v40  ;;  %v605_v7 = vrot.slane %v1915_v44, %v1918_v45 }
  0x94   : > { %v655_v8 = vrot.slane %v639_v0, %v1921_v46  ;;  %v669_v10 = vrot.slane %v641_v2, %v1921_v46  ;;  %v585_v11 = vrot.slane %v569_v3, %v1911_v40  ;;  %v481_v12 = vrot.slane %v1929_v49, %v1911_v40 }
  0x95   : > { %v553_v13 = vsel %vm513_vm12, %v549_v6, 0.0  ;;  %v625_v14 = vrot.slane %v605_v7, %v1911_v40  ;;  %v517_v15 = vrot.slane %v1934_v51, %v1911_v40  ;;  %v557_v19 = vrot.slane %v1970_v17, %v1911_v40 }
  0x96   : > { %v673_v20 = vcombine.high %v655_v8, %v669_v10  ;;  %vm589_vm13 = vcmp.eq.s32.totalorder %v1887_v1, %v585_v11  ;;  %v497_v45 = vrot.slane %v481_v12, %v1911_v40  ;;  %v593_v21 = vrot.slane %v1913_v43, %v1911_v40 }
  0x97   : > { %v629_v22 = vsel %vm589_vm13, %v625_v14, 0.0  ;;  %v537_v49 = vrot.slane %v517_v15, %v1911_v40  ;;  %v573_v23 = vrot.slane %v557_v19, %v1911_v40  ;;  %v489_v24 = vrot.slane %v1931_v50, %v1911_v40 }
  0x98   : > { %v701_v51 = vrot.slane %v673_v20, %v1921_v46  ;;  %v2053_v25 = vadd.f32 %v629_v22, %v553_v13  ;;  %vm510_vm14 = vcmp.eq.s32.totalorder %v1887_v1, %v497_v45  ;;  %v613_v17 = vrot.slane %v593_v21, %v1911_v40 }
  0x99   : > { %v550_v26 = vsel %vm510_vm14, %v537_v49, 0.0  ;;  %vm586_vm15 = vcmp.eq.s32.totalorder %v1887_v1, %v573_v23  ;;  %v505_v43 = vrot.slane %v489_v24, %v1911_v40  ;;  %v525_v27 = vrot.slane %v1937_v52, %v1911_v40 }
  0x9a   : > { %v705_v28 = vcombine.high %v701_v51, %v701_v51  ;;  %v626_v29 = vsel %vm586_vm15, %v613_v17, 0.0  ;;  %v565_v50 = vrot.slane %v1973_v18, %v1911_v40  ;;  %v601_v30 = vrot.slane %v1915_v44, %v1911_v40 }
  0x9b   : > { %v2065_v31 = vadd.f32 %v626_v29, %v550_v26  ;;  %vm512_vm0 = vcmp.eq.s32.totalorder %v1887_v1, %v505_v43  ;;  %v545_v32 = vrot.slane %v525_v27, %v1911_v40  ;;  %v672_v33 = vcombine.low %v655_v8, %v669_v10 }
  0x9c   : > { %v825_v34 = vrot.slane %v705_v28, %v1911_v40  ;;  %v833_v35 = vrot.slane %v705_v28, %v1924_v47  ;;  %v821_v52 = vrot.slane %v705_v28, %v1907_v38  ;;  %v581_v36 = vrot.slane %v565_v50, %v1911_v40 }
  0x9d   : > { %v552_v37 = vsel %vm512_vm0, %v545_v32, 0.0  ;;  %v621_v18 = vrot.slane %v601_v30, %v1911_v40  ;;  %v829_v44 = vrot.slane %v705_v28, %v1927_v48  ;;  %v687_v39 = vrot.slane %v672_v33, %v1921_v46 }
  0x9e   : > { %v895_v41 = vmul.f32 %v825_v34, %v2028_v5  ;;  %v897_v42 = vmul.f32 %v833_v35, %v2053_v25  ;;  %v894_v53 = vmul.f32 %v821_v52, %v2065_v31  ;;  %vm588_vm1 = vcmp.eq.s32.totalorder %v1887_v1, %v581_v36 }
  0x9f   : > { %v628_v54 = vsel %vm588_vm1, %v621_v18, 0.0  ;;  %v703_v55 = vcombine.high %v687_v39, %v687_v39  ;;  %v793_v60 = vrot.slane %v701_v51, %v1911_v40  ;;  %v801_v61 = vrot.slane %v701_v51, %v1924_v47 }
  0xa0   : > { %927 = vmatprep.subr.mxu0 %v895_v41  ;;  %1010 = vmatprep.subr.mxu1 %v897_v42  ;;  %v2082_v62 = vadd.f32 %v628_v54, %v552_v37  ;;  %v789_v63 = vrot.slane %v701_v51, %v1907_v38  ;;  %v797_v0 = vrot.slane %v701_v51, %v1927_v48  ;;  %vm901_vm2 = vcmask 523264  }
  0xa1   : > { %928 = vmatpush1.msra.mxu0 %v894_v53  ;;  %v809_v2 = vrot.slane %v703_v55, %v1911_v40  ;;  %v817_v3 = vrot.slane %v703_v55, %v1924_v47  ;;  %v805_v6 = vrot.slane %v703_v55, %v1907_v38  ;;  %v813_v7 = vrot.slane %v703_v55, %v1927_v48 }
  0xa2   : > { %v896_v8 = vmul.f32 %v829_v44, %v2082_v62  ;;  %v887_v10 = vmul.f32 %v793_v60, %v2028_v5  ;;  %v889_v11 = vmul.f32 %v801_v61, %v2053_v25  ;;  %v886_v12 = vmul.f32 %v789_v63, %v2065_v31 }
  0xa3   : > { %v891_v13 = vmul.f32 %v809_v2, %v2028_v5  ;;  %v893_v14 = vmul.f32 %v817_v3, %v2053_v25  ;;  %v890_v15 = vmul.f32 %v805_v6, %v2065_v31  ;;  %v892_v19 = vmul.f32 %v813_v7, %v2082_v62 }
  0xa4   : > { %1011 = vmatpush1.msra.mxu1 %v896_v8  ;;  %v888_v20 = vmul.f32 %v797_v0, %v2082_v62  ;;  %v777_v45 = vrot.slane %v687_v39, %v1911_v40  ;;  %v785_v21 = vrot.slane %v687_v39, %v1924_v47  ;;  %v773_v22 = vrot.slane %v687_v39, %v1907_v38 }
  0xa5   : > { %929 = vmatprep.subr.mxu0 %v891_v13  ;;  %1012 = vmatprep.subr.mxu1 %v893_v14  ;;  %v781_v49 = vrot.slane %v687_v39, %v1927_v48  ;;  %v638_v23 = vcombine.low %v2008_v56, %v2010_v57  ;;  %v640_v24 = vcombine.low %v2012_v58, %v2014_v59  ;;  %vm1287_vm11 = vcmask 1041409  }
  0xa6   : > { %930 = vmatpush1.msra.mxu0 %v890_v15  ;;  %1013 = vmatpush1.msra.mxu1 %v892_v19  ;;  %v883_v51 = vmul.f32 %v777_v45, %v2028_v5  ;;  %v885_v17 = vmul.f32 %v785_v21, %v2053_v25  ;;  %v882_v26 = vmul.f32 %v773_v22, %v2065_v31  ;;  %v898_v19 = vld [vmem:[#allocation9] sm:$0xff]  ;;  %vm1289_vm12 = vcmask 1045509  }
  0xa7   : > { %931 = vmatprep.subr.mxu0 %v887_v10  ;;  %1014 = vmatprep.subr.mxu1 %v889_v11  ;;  %v884_v43 = vmul.f32 %v781_v49, %v2082_v62  ;;  %v648_v27 = vrot.slane %v638_v23, %v1921_v46  ;;  %v662_v28 = vrot.slane %v640_v24, %v1921_v46  ;;  %vm1292_vm13 = vcmask 1042434  }
  0xa8   : > { %932 = vmatpush1.msra.mxu0 %v886_v12  ;;  %1015 = vmatpush1.msra.mxu1 %v888_v20  ;;  %vm1294_vm14 = vcmask 1046534  }
  0xa9   : > { %933 = vmatprep.subr.mxu0 %v883_v51  ;;  %1016 = vmatprep.subr.mxu1 %v885_v17  ;;  %v671_v56 = vcombine.high %v648_v27, %v662_v28  ;;  %v670_v57 = vcombine.low %v648_v27, %v662_v28 }
  0xaa   : > { %934 = vmatpush1.msra.mxu0 %v882_v26  ;;  %1017 = vmatpush1.msra.mxu1 %v884_v43 }
  0xab   : > { %v694_v58 = vrot.slane %v671_v56, %v1921_v46  ;;  %v680_v59 = vrot.slane %v670_v57, %v1921_v46 }
  0xad   : > { %v704_v29 = vcombine.high %v694_v58, %v694_v58  ;;  %v702_v50 = vcombine.high %v680_v59, %v680_v59  ;;  %v729_v30 = vrot.slane %v694_v58, %v1911_v40  ;;  %v737_v32 = vrot.slane %v694_v58, %v1924_v47 }
  0xae   : > { %v725_v33 = vrot.slane %v694_v58, %v1907_v38  ;;  %v733_v34 = vrot.slane %v694_v58, %v1927_v48  ;;  %v713_v35 = vrot.slane %v680_v59, %v1911_v40  ;;  %v721_v52 = vrot.slane %v680_v59, %v1924_v47 }
  0xaf   : > { %v761_v36 = vrot.slane %v704_v29, %v1911_v40  ;;  %v769_v37 = vrot.slane %v704_v29, %v1924_v47  ;;  %v757_v46 = vrot.slane %v704_v29, %v1907_v38  ;;  %v765_v18 = vrot.slane %v704_v29, %v1927_v48 }
  0xb0   : > { %v745_v44 = vrot.slane %v702_v50, %v1911_v40  ;;  %v753_v39 = vrot.slane %v702_v50, %v1924_v47  ;;  %v741_v41 = vrot.slane %v702_v50, %v1907_v38  ;;  %v749_v42 = vrot.slane %v702_v50, %v1927_v48 }
  0xb1   : > { %v879_v53 = vmul.f32 %v761_v36, %v2028_v5  ;;  %v881_v54 = vmul.f32 %v769_v37, %v2053_v25  ;;  %v878_v55 = vmul.f32 %v757_v46, %v2065_v31  ;;  %v880_v60 = vmul.f32 %v765_v18, %v2082_v62 }
  0xb2   : > { %v875_v61 = vmul.f32 %v745_v44, %v2028_v5  ;;  %v877_v63 = vmul.f32 %v753_v39, %v2053_v25  ;;  %v874_v0 = vmul.f32 %v741_v41, %v2065_v31  ;;  %v876_v2 = vmul.f32 %v749_v42, %v2082_v62 }
  0xb3   : > { %935 = vmatprep.subr.mxu0 %v879_v53  ;;  %1018 = vmatprep.subr.mxu1 %v881_v54  ;;  %v871_v3 = vmul.f32 %v729_v30, %v2028_v5  ;;  %v873_v6 = vmul.f32 %v737_v32, %v2053_v25  ;;  %v870_v7 = vmul.f32 %v725_v33, %v2065_v31 }
  0xb4   : > { %936 = vmatpush1.msra.mxu0 %v878_v55  ;;  %1019 = vmatpush1.msra.mxu1 %v880_v60  ;;  %v872_v8 = vmul.f32 %v733_v34, %v2082_v62  ;;  %v867_v10 = vmul.f32 %v713_v35, %v2028_v5  ;;  %v869_v11 = vmul.f32 %v721_v52, %v2053_v25  ;;  %v899_v5 = vld [vmem:[#allocation9 + $0x8] sm:$0xff]  ;;  %v900_v25 = vld [vmem:[#allocation9 + $0x10] sm:$0xff] }
  0xb5   : > { %937 = vmatprep.subr.mxu0 %v875_v61  ;;  %1020 = vmatprep.subr.mxu1 %v877_v63  ;;  %v709_v12 = vrot.slane %v680_v59, %v1907_v38  ;;  %v717_v13 = vrot.slane %v680_v59, %v1927_v48 }
  0xb6   : > { %938 = vmatpush1.msra.mxu0 %v874_v0  ;;  %1021 = vmatpush1.msra.mxu1 %v876_v2 }
  0xb7   : > { %939 = vmatprep.subr.mxu0 %v871_v3  ;;  %1022 = vmatprep.subr.mxu1 %v873_v6  ;;  %v866_v14 = vmul.f32 %v709_v12, %v2065_v31  ;;  %v868_v15 = vmul.f32 %v717_v13, %v2082_v62  ;;  %v1450_v31 = vld [vmem:[%s1877_s8 + $0x2] ss:$4 sm:$0xf]  ;;  %s1632_s8 = scalar_lea.vmem %s1631_s6, 512 }
  0xb8   : > { %940 = vmatpush1.msra.mxu0 %v870_v7  ;;  %1023 = vmatpush1.msra.mxu1 %v872_v8  ;;  %v1079_v62 = vsub.f32 %v1450_v31, %v264_v9  ;;  %p1634_p7 = scmp.lt.s32.totalorder %s1632_s8, %s1626_s5 }
  0xb9   : > { %941 = vmatprep.subr.mxu0 %v867_v10  ;;  %1024 = vmatprep.subr.mxu1 %v869_v11 }
  0xba   : > { %942 = vmatpush1.msra.mxu0 %v866_v14  ;;  %1025 = vmatpush1.msra.mxu1 %v868_v15  ;;  %v1080_v20 = vmul.f32 %v1079_v62, %v272_v16  ;;  %p1635_p10 = por %p1634_p7, %p1633_p3 }
  0xbb   : > { %1444 = vmatmul.mubr.msk.f32.vlgmr.msra.gmra.mxu0 %vm901_vm2, %v898_v19  ;;  %1447 = vmatmul.mubr.msk.f32.vlgmr.msra.gmra.mxu1 %vm901_vm2, %v898_v19 }
  0xbc   : > { %981 = vmatprep.mubr.f32.mxu0 %v1711_v4  ;;  %1064 = vmatprep.mubr.f32.mxu1 %v1711_v4  ;;  %v1081_v45 = vmax.f32 %v1080_v20, 0.0  ;;  %p1636_p12 = pnand %p1635_p10, %p1629_p9 }
  0xbe   : > { %v1082_v21 = vmin.f32 %v1081_v45, 7.0 }
  0xbf   : > { %1445 = vmatmul.mubr.msk.f32.gmra.mxu0 %vm901_vm2, %v899_v5  ;;  %1448 = vmatmul.mubr.msk.f32.gmra.mxu1 %vm901_vm2, %v899_v5 }
  0xc0   : > { %987 = vmatprep.mubr.f32.mxu0 %v1711_v4  ;;  %1070 = vmatprep.mubr.f32.mxu1 %v1711_v4  ;;  %v1083_v22 = vfloor.f32 %v1082_v21 }
  0xc2   : > { %v1084_v49 = vmax.f32 %v1083_v22, 0.0 }
  0xc3   : > { %1446 = vmatmul.mubr.msk.f32.gmra.mxu0 %vm901_vm2, %v900_v25  ;;  %1449 = vmatmul.mubr.msk.f32.gmra.mxu1 %vm901_vm2, %v900_v25 }
  0xc4   : > { %v1085_v23 = vmin.f32 %v1084_v49, 6.0 }
  0xc6   : > { %v1462_v24 = vtrunc.f32 %v1085_v23  ;;  %v1087_v17 = vsub.f32 %v1082_v21, %v1085_v23 }
  0xc8   : > { %v1463_v51 = vcvt.f32.s32 %v1462_v24  ;;  %v1108_v4 = vsub.f32 1.0, %v1087_v17  ;;  %v1159_v29 = vrot.slane %v1087_v17, %v1907_v38  ;;  %v1167_v30 = vrot.slane %v1087_v17, %v1927_v48 }
  0xc9   : > { %v1163_v33 = vrot.slane %v1087_v17, %v1911_v40 }
  0xca   : > { %v1134_v26 = vadd.s32 1, %v1463_v51  ;;  %v1091_v43 = vrot.slane %v1463_v51, %v1907_v38  ;;  %v1099_v28 = vrot.slane %v1463_v51, %v1927_v48  ;;  %v1095_v16 = vrot.slane %v1463_v51, %v1911_v40 }
  0xcb   : > { %v1103_v57 = vrot.slane %v1463_v51, %v1924_v47  ;;  %v1113_v59 = vrot.slane %v1108_v4, %v1907_v38  ;;  %v1121_v50 = vrot.slane %v1108_v4, %v1927_v48  ;;  %v1117_v32 = vrot.slane %v1108_v4, %v1911_v40 }
  0xcc   : > { %v1138_v27 = vrot.slane %v1134_v26, %v1907_v38  ;;  %v1146_v9 = vrot.slane %v1134_v26, %v1927_v48  ;;  %v1142_v56 = vrot.slane %v1134_v26, %v1911_v40  ;;  %v1150_v58 = vrot.slane %v1134_v26, %v1924_v47 }
  0xcd   : > { %vm1104_vm3 = vcmp.eq.s32.totalorder %v1887_v1, %v1091_v43  ;;  %vm1106_vm5 = vcmp.eq.s32.totalorder %v1887_v1, %v1099_v28  ;;  %v1125_v34 = vrot.slane %v1108_v4, %v1924_v47  ;;  %v1171_v38 = vrot.slane %v1087_v17, %v1924_v47 }
  0xce   : > { %vm1151_vm4 = vcmp.eq.s32.totalorder %v1887_v1, %v1138_v27  ;;  %vm1153_vm6 = vcmp.eq.s32.totalorder %v1887_v1, %v1146_v9  ;;  %vm1105_vm7 = vcmp.eq.s32.totalorder %v1887_v1, %v1095_v16  ;;  %vm1152_vm8 = vcmp.eq.s32.totalorder %v1887_v1, %v1142_v56 }
  0xcf   : > { %vm1107_vm9 = vcmp.eq.s32.totalorder %v1887_v1, %v1103_v57  ;;  %vm1154_vm10 = vcmp.eq.s32.totalorder %v1887_v1, %v1150_v58  ;;  %v1130_v48 = vsel %vm1104_vm3, %v1113_v59, 0.0  ;;  %v1176_v35 = vsel %vm1151_vm4, %v1159_v29, 0.0 }
  0xd0   : > { %v1132_v52 = vsel %vm1106_vm5, %v1121_v50, 0.0  ;;  %v1178_v36 = vsel %vm1153_vm6, %v1167_v30, 0.0  ;;  %v1131_v37 = vsel %vm1105_vm7, %v1117_v32, 0.0  ;;  %v1177_v46 = vsel %vm1152_vm8, %v1163_v33, 0.0 }
  0xd1   : > { %v1133_v18 = vsel %vm1107_vm9, %v1125_v34, 0.0  ;;  %v1179_v40 = vsel %vm1154_vm10, %v1171_v38, 0.0  ;;  %v1180_v44 = vadd.f32 %v1176_v35, %v1130_v48  ;;  %v1182_v39 = vadd.f32 %v1178_v36, %v1132_v52 }
  0xd2   : > { %v1181_v41 = vadd.f32 %v1177_v46, %v1131_v37  ;;  %v1183_v47 = vadd.f32 %v1179_v40, %v1133_v18 }
 0x17b   : > { %v977_v42 = vpop.f32.mrf.mxu0  ;;  %v1060_v53 = vpop.f32.mrf.mxu1 }
 0x17c   : > { %v1184_v60 = vmul.f32 %v1180_v44, %v977_v42  ;;  %v1186_v61 = vmul.f32 %v1182_v39, %v1060_v53 }
 0x17d   : > { %v979_v54 = vpop.f32.mrf.mxu0  ;;  %v1062_v55 = vpop.f32.mrf.mxu1 }
 0x17e   : > { %v1185_v63 = vmul.f32 %v1181_v41, %v979_v54  ;;  %v1187_v1 = vmul.f32 %v1183_v47, %v1062_v55  ;;  %v1196_v12 = vrot.slane %v1184_v60, 4  ;;  %v1208_v13 = vrot.slane %v1186_v61, 4 }
 0x17f   : > { %v983_v0 = vpop.f32.mrf.mxu0  ;;  %v1066_v2 = vpop.f32.mrf.mxu1 }
 0x180   : > { %v1202_v3 = vrot.slane %v1185_v63, 4  ;;  %v1214_v6 = vrot.slane %v1187_v1, 4  ;;  %v1188_v7 = vmul.f32 %v1180_v44, %v983_v0  ;;  %v1190_v8 = vmul.f32 %v1182_v39, %v1066_v2 }
 0x181   : > { %v985_v10 = vpop.f32.mrf.mxu0  ;;  %v1068_v11 = vpop.f32.mrf.mxu1  ;;  %v1197_v22 = vadd.f32 %v1196_v12, %v1184_v60  ;;  %v1209_v49 = vadd.f32 %v1208_v13, %v1186_v61 }
 0x182   : > { %v1220_v14 = vrot.slane %v1188_v7, 4  ;;  %v1232_v15 = vrot.slane %v1190_v8, 4  ;;  %v1189_v19 = vmul.f32 %v1181_v41, %v985_v10  ;;  %v1191_v5 = vmul.f32 %v1183_v47, %v1068_v11 }
 0x183   : > { %v1203_v25 = vadd.f32 %v1202_v3, %v1185_v63  ;;  %v1215_v31 = vadd.f32 %v1214_v6, %v1187_v1  ;;  %v989_v26 = vpop.f32.mrf.mxu0  ;;  %v1072_v4 = vpop.f32.mrf.mxu1  ;;  %v1198_v59 = vrot.slane %v1197_v22, 2  ;;  %v1210_v29 = vrot.slane %v1209_v49, 2 }
 0x184   : > { %v1221_v62 = vadd.f32 %v1220_v14, %v1188_v7  ;;  %v1233_v20 = vadd.f32 %v1232_v15, %v1190_v8  ;;  %v1226_v45 = vrot.slane %v1189_v19, 4  ;;  %v1238_v21 = vrot.slane %v1191_v5, 4 }
 0x185   : > { %v1204_v43 = vrot.slane %v1203_v25, 2  ;;  %v1216_v27 = vrot.slane %v1215_v31, 2  ;;  %v1192_v57 = vmul.f32 %v1180_v44, %v989_v26  ;;  %v1194_v58 = vmul.f32 %v1182_v39, %v1072_v4  ;;  %v991_v32 = vpop.f32.mrf.mxu0  ;;  %v1074_v33 = vpop.f32.mrf.mxu1 }
 0x186   : > { %v1222_v23 = vrot.slane %v1221_v62, 2  ;;  %v1234_v24 = vrot.slane %v1233_v20, 2  ;;  %v1227_v51 = vadd.f32 %v1226_v45, %v1189_v19  ;;  %v1239_v17 = vadd.f32 %v1238_v21, %v1191_v5 }
 0x187   : > { %v1205_v34 = vadd.f32 %v1204_v43, %v1203_v25  ;;  %v1217_v38 = vadd.f32 %v1216_v27, %v1215_v31  ;;  %v1244_v48 = vrot.slane %v1192_v57, 4  ;;  %v1256_v35 = vrot.slane %v1194_v58, 4 }
 0x188   : > { %v1223_v28 = vadd.f32 %v1222_v23, %v1221_v62  ;;  %v1235_v9 = vadd.f32 %v1234_v24, %v1233_v20  ;;  %v1228_v16 = vrot.slane %v1227_v51, 2  ;;  %v1240_v56 = vrot.slane %v1239_v17, 2 }
 0x189   : > { %v1245_v18 = vadd.f32 %v1244_v48, %v1192_v57  ;;  %v1257_v40 = vadd.f32 %v1256_v35, %v1194_v58  ;;  %v1193_v42 = vmul.f32 %v1181_v41, %v991_v32  ;;  %v1195_v53 = vmul.f32 %v1183_v47, %v1074_v33 }
 0x18a   : > { %v1229_v50 = vadd.f32 %v1228_v16, %v1227_v51  ;;  %v1241_v30 = vadd.f32 %v1240_v56, %v1239_v17  ;;  %v1224_v52 = vrot.slane %v1223_v28, 1  ;;  %v1236_v36 = vrot.slane %v1235_v9, 1 }
 0x18b   : > { %v1199_v44 = vadd.f32 %v1198_v59, %v1197_v22  ;;  %v1211_v39 = vadd.f32 %v1210_v29, %v1209_v49  ;;  %v1246_v60 = vrot.slane %v1245_v18, 2  ;;  %v1258_v61 = vrot.slane %v1257_v40, 2 }
 0x18c   : > { %v1230_v37 = vrot.slane %v1229_v50, 1  ;;  %v1242_v46 = vrot.slane %v1241_v30, 1  ;;  %v1250_v63 = vrot.slane %v1193_v42, 4  ;;  %v1262_v1 = vrot.slane %v1195_v53, 4 }
 0x18d   : > { %v1206_v0 = vrot.slane %v1205_v34, 1  ;;  %v1218_v2 = vrot.slane %v1217_v38, 1  ;;  %v1225_v3 = vadd.f32 %v1224_v52, %v1223_v28  ;;  %v1237_v6 = vadd.f32 %v1236_v36, %v1235_v9 }
 0x18e   : > { %v1231_v54 = vadd.f32 %v1230_v37, %v1229_v50  ;;  %v1243_v55 = vadd.f32 %v1242_v46, %v1241_v30  ;;  %v1247_v7 = vadd.f32 %v1246_v60, %v1245_v18  ;;  %v1259_v8 = vadd.f32 %v1258_v61, %v1257_v40 }
 0x18f   : > { %v1251_v10 = vadd.f32 %v1250_v63, %v1193_v42  ;;  %v1263_v11 = vadd.f32 %v1262_v1, %v1195_v53  ;;  %v1200_v12 = vrot.slane %v1199_v44, 1  ;;  %v1212_v13 = vrot.slane %v1211_v39, 1 }
 0x190   : > { %v1282_v41 = vcombine.low %v1225_v3, %v1231_v54  ;;  %v1283_v47 = vcombine.low %v1237_v6, %v1243_v55  ;;  %v1207_v19 = vadd.f32 %v1206_v0, %v1205_v34  ;;  %v1219_v5 = vadd.f32 %v1218_v2, %v1217_v38 }
 0x191   : > { %v1252_v14 = vrot.slane %v1251_v10, 2  ;;  %v1264_v15 = vrot.slane %v1263_v11, 2  ;;  %v1248_v25 = vrot.slane %v1247_v7, 1  ;;  %v1260_v31 = vrot.slane %v1259_v8, 1 }
 0x192   : > { %v1201_v45 = vadd.f32 %v1200_v12, %v1199_v44  ;;  %v1213_v21 = vadd.f32 %v1212_v13, %v1211_v39  ;;  %v1286_v22 = vrot.slane %v1282_v41, 7  ;;  %v1296_v49 = vrot.slane %v1283_v47, 7 }
 0x193   : > { %v1253_v62 = vadd.f32 %v1252_v14, %v1251_v10  ;;  %v1265_v20 = vadd.f32 %v1264_v15, %v1263_v11  ;;  %v1249_v26 = vadd.f32 %v1248_v25, %v1247_v7  ;;  %v1261_v4 = vadd.f32 %v1260_v31, %v1259_v8 }
 0x194   : > { %v1280_v51 = vcombine.low %v1201_v45, %v1207_v19  ;;  %v1281_v17 = vcombine.low %v1213_v21, %v1219_v5 }
 0x195   : > { %v1254_v23 = vrot.slane %v1253_v62, 1  ;;  %v1266_v24 = vrot.slane %v1265_v20, 1 }
 0x196   : > { %v1288_v16 = vsel %vm1287_vm11, %v1286_v22, %v1280_v51  ;;  %v1297_v56 = vsel %vm1287_vm11, %v1296_v49, %v1281_v17 }
 0x197   : > { %v1255_v43 = vadd.f32 %v1254_v23, %v1253_v62  ;;  %v1267_v27 = vadd.f32 %v1266_v24, %v1265_v20  ;;  %v1290_v59 = vsel %vm1289_vm12, %v1286_v22, %v1288_v16  ;;  %v1298_v29 = vsel %vm1289_vm12, %v1296_v49, %v1297_v56 }
 0x199   : > { %v1284_v28 = vcombine.low %v1249_v26, %v1255_v43  ;;  %v1285_v9 = vcombine.low %v1261_v4, %v1267_v27 }
 0x19b   : > { %v1291_v57 = vrot.slane %v1284_v28, 6  ;;  %v1299_v58 = vrot.slane %v1285_v9, 6 }
 0x19d   : > { %v1293_v50 = vsel %vm1292_vm13, %v1291_v57, %v1290_v59  ;;  %v1300_v30 = vsel %vm1292_vm13, %v1299_v58, %v1298_v29 }
 0x19e   : > { %v1295_v32 = vsel %vm1294_vm14, %v1291_v57, %v1293_v50  ;;  %v1301_v33 = vsel %vm1294_vm14, %v1299_v58, %v1300_v30 }
 0x19f   : > { %1304 = vst [vmem:[%s253_s24] sm:$0x77] %v1295_v32  ;;  %1305 = vst [vmem:[%s253_s24 + $0x8] sm:$0x77] %v1301_v33 }
 0x1a0   : > { %1639 = shalt.err (!%p1636_p12)
}
 0x1a1   : > { %s1640_s9 = scalar_lea.hbm %s2192_s30, 256  ;;  %s1644_s11 = scalar_lea.hbm %s2239_s4, 512 }
 0x1a2   : > { %p1641_p5 = scmp.ne.s32.totalorder %s2192_s30, %s1640_s9  ;;  %p1645_p13 = scmp.lt.s32.totalorder %s2192_s30, %s2239_s4 }
 0x1a3   : > { %p1646_p11 = scmp.lt.s32.totalorder %s1644_s11, %s1640_s9 }
 0x1a4   : > { %p1642_p0 = pnand %p1641_p5, %p2259_p6 }
 0x1a5   : > { %p1647_p2 = por %p1646_p11, %p1645_p13 }
 0x1a6   : > { %p1643_p1 = pneg %p1642_p0 }
 0x1a8   : > { %p1648_p4 = pnand %p1647_p2, %p1643_p1 }
 0x1aa   : > { %1651 = shalt.err (!%p1648_p4)
}
 0x1ab   : > { %1478 = dma.vmem_to_hbm [thread:$0]  (%p2259_p6), %s2194_s28, 256, %s2192_s30, %s1307_s19  }
 0x1ac PF: > { %s1333_s13 = sand.u32 1, %s1690_s15   ;;  %p2260_p8 = scmp.ne.s32.totalorder %s2245_s22, 0 }
 0x1ad   : > { %p2261_p9 = scmp.ge.s32.totalorder %s1702_s18, 2  ;;  %s1334_s20 = scalar_lea.sflag [#allocation4], %s1333_s13 }
 0x1af   : > { %p1495_p3 = pnand %p2261_p9, %p2260_p8 }
 0x1b1   : > { %p1496_p7 = pneg %p1495_p3 }
 0x1b3   : > { %1685 = dma.done.wait (%p1496_p7), %s1334_s20, 256  }
 0x1b4   : > { %1687 = vsyncadd (%p1496_p7), %s1334_s20, 4294967040  ;;  %p20_p10 = scmp.ge.s32.totalorder %s1817_s14, 4   ;;  %s2262_s15 = smov %s1694_s16 }
 0x1b5   : > { %s2263_s16 = smov %s1698_s17  ;;  %s2264_s17 = smov %s1827_s25 }
 0x1b6   : > { %s2265_s18 = smov %s1817_s14  ;;  %22 = sbr.rel (!%p20_p10) target bundleno = 8 (0x8), region = 96 }
 0x1bb   :  { %1339 = vsyncpa [#allocation3], 1 }
 0x1bc   :  { %1341 = vsyncpa [#allocation3 + $0x1], 1 }
 0x1bd   :  { %1342 = vsyncpa [#allocation10], 1 }
 0x1be   :  { %1343 = vsyncpa [#allocation4], 1 }
 0x1bf   :  { %1345 = vsyncpa [#allocation4 + $0x1], 1 }
 0x1c0   :  { %1346 = vsyncpa [#allocation5], 1 }
 0x1c1   :  { %1348 = vsyncpa [#allocation5 + $0x1], 1 }
 0x1c2   :  { %1349 = vsyncpa [#allocation6], 1 }
 0x1c3   :  { %1351 = vsyncpa [#allocation6 + $0x1], 1 }

</bundles_post_ra>
